<compile_context>
chip_gen: v7x
topology: tpu7x:2x2x1
jax: 0.10.0
libtpu: 0.0.40
codegen_flags: <defaults>
</compile_context>

<pallas_src>
import functools

import jax
import jax.numpy as jnp
from jax.experimental import pallas as pl
from jax.experimental.pallas import tpu as pltpu

# Lane-dense spatial budget per grid step (elements on the 128-lane axis).
# Padded slab per buffer is 8*MAX_TILE*4 B = 2 MiB (C=3 pads to 8 sublanes);
# double-buffered in+out ~= 8 MiB, fitting every generation's scoped VMEM.
MAX_TILE = 65536
# Max batch elements folded into one grid step (short unrolled loop in-kernel).
MAX_NB = 8


def conv1x1_clamp_kernel(x_ref, w_ref, b_ref, o_ref, *, min_value, max_value, nb):
    # x_ref: VMEM (nb, C,  TS)  input slab: channels on sublanes, spatial on lanes
    # w_ref: VMEM (OC, C)       1x1 conv weight (grid-resident)
    # b_ref: VMEM (OC, 1)       bias (grid-resident)
    # o_ref: VMEM (nb, OC, TS)  output slab, lane-dense stores
    #
    # In-kernel upcast: DMA native dtype, promote to f32 for the accumulate.
    w = w_ref[...].astype(jnp.float32)            # (OC, C)
    b = b_ref[...].astype(jnp.float32)            # (OC, 1)
    C = w.shape[1]

    for n in range(nb):                           # short unrolled batch loop
        x = x_ref[n].astype(jnp.float32)          # (C, TS)
        # VPU formulation of the tiny (OC x C) contraction:
        #   y[o, :] = sum_c w[o, c] * x[c, :]
        # C broadcast-MACs per (OC, TS) slab; MXU would be wasted at C=3, OC=8.
        y = w[:, 0:1] * x[0:1, :]                 # (OC, TS)
        for c in range(1, C):
            y = y + w[:, c:c + 1] * x[c:c + 1, :]
        y = y + b                                 # (OC, 1) broadcast along lanes
        y = jnp.maximum(y, min_value)             # torch.clamp_min
        y = jnp.minimum(y, max_value)             # torch.clamp_max
        o_ref[n] = y.astype(o_ref.dtype)


def _round_up(x, m):
    return ((x + m - 1) // m) * m


def _choose_tiling(N, HW):
    """Pick (nb, ts): batch elements per step and lane-dense spatial tile."""
    if HW > MAX_TILE:
        return 1, MAX_TILE                         # big images: tile spatial axis

    ts = HW                                        # full-extent last dim is legal
    nb_cap = min(max(1, MAX_TILE // max(HW, 1)), MAX_NB, N)
    nb = 1
    for d in range(nb_cap, 0, -1):                 # largest divisor of N in cap
        if N % d == 0:
            nb = d
            break

    # v7x has 2 TensorCores: guarantee >= 2 parallel grid steps when the
    # problem allows it, so "parallel" dimension_semantics can shard work.
    n_steps = (N // nb) * ((HW + ts - 1) // ts)
    if n_steps == 1:
        if HW >= 256:
            ts = _round_up((HW + 1) // 2, 128)     # split spatial axis in two
        elif nb > 1:
            for d in range(nb // 2, 0, -1):        # split the batch instead
                if N % d == 0:
                    nb = d
                    break
    return nb, ts


def model_forward(x_nchw, w_oc_ic, bias_oc, min_value, max_value):
    N, C, H, W = x_nchw.shape
    OC = w_oc_ic.shape[0]
    HW = H * W

    # Free views only — no XLA transposes or dtype copies around the kernel.
    x3d = x_nchw.reshape(N, C, HW)                 # (N, C, HW), native dtype
    w = w_oc_ic                                    # (OC, C)
    b = bias_oc.reshape(OC, 1)                     # (OC, 1)

    nb, ts = _choose_tiling(N, HW)
    grid = (pl.cdiv(N, nb), pl.cdiv(HW, ts))

    kernel = functools.partial(
        conv1x1_clamp_kernel,
        min_value=float(min_value),
        max_value=float(max_value),
        nb=nb,
    )

    out3d = pl.pallas_call(
        kernel,
        out_shape=jax.ShapeDtypeStruct((N, OC, HW), x_nchw.dtype),
        grid=grid,
        in_specs=[
            pl.BlockSpec((nb, C, ts), lambda n, s: (n, 0, s)),   # input slab
            pl.BlockSpec((OC, C), lambda n, s: (0, 0)),          # weight (resident)
            pl.BlockSpec((OC, 1), lambda n, s: (0, 0)),          # bias (resident)
        ],
        out_specs=pl.BlockSpec((nb, OC, ts), lambda n, s: (n, 0, s)),
        compiler_params=pltpu.CompilerParams(
            dimension_semantics=("parallel", "parallel"),
            # Explicit limit: the double-buffered padded working set (<= ~8 MiB
            # at MAX_TILE) fits comfortably; raising above v5e's 16 MiB default
            # leaves headroom while staying within v7x's 64 MiB physical VMEM.
            vmem_limit_bytes=32 * 1024 * 1024,
        ),
    )(x3d, w, b)

    # (N, OC, HW) -> NCHW: free view.
    return out3d.reshape(N, OC, H, W)


if __name__ == "__main__":
    key = jax.random.PRNGKey(0)
    kx, kw, kb, kx2 = jax.random.split(key, 4)

    # TODO(synk): self.t1 is undefined in the source module (__init__ is `pass`);
    # deterministically instantiated here as a 1x1 Conv2d(3, 8) with bias.
    C, OC = 3, 8
    w = 0.1 * jax.random.normal(kw, (OC, C), dtype=jnp.float32)   # (out_ch, in_ch)
    b = 0.1 * jax.random.normal(kb, (OC,), dtype=jnp.float32)
    min_value, max_value = -0.5, 0.5

    def ref_fn(x):
        r = jnp.einsum("nchw,oc->nohw", x.astype(jnp.float32), w) + b.reshape(1, OC, 1, 1)
        r = jnp.maximum(r, min_value)              # clamp_min
        r = jnp.minimum(r, max_value)              # clamp_max
        return r

    # Test 1: small batched input (2, 3, 16, 16) — exercises batch packing and
    # the >=2-parallel-steps rule.
    x1 = jax.random.normal(kx, (2, C, 16, 16), dtype=jnp.float32)
    out1 = jax.block_until_ready(model_forward(x1, w, b, min_value, max_value))
    assert out1.shape == (2, OC, 16, 16)
    assert jnp.allclose(out1, ref_fn(x1), atol=1e-5), "mismatch vs reference (test 1)"

    # Test 2: HW (= 400) not a multiple of the 128-lane tile -> ragged tail
    # masking of the last spatial block.
    x2 = jax.random.normal(kx2, (1, C, 20, 20), dtype=jnp.float32)
    out2 = jax.block_until_ready(model_forward(x2, w, b, min_value, max_value))
    assert out2.shape == (1, OC, 20, 20)
    assert jnp.allclose(out2, ref_fn(x2), atol=1e-5), "mismatch vs reference (test 2)"

    print("KERNEL_OK")
</pallas_src>

<mosaic_0001>
module attributes {stable_mosaic.version = 11 : i64} {
  func.func @conv1x1_clamp_kernel(%arg0: i32, %arg1: i32, %arg2: memref<2x3x128xf32, #tpu.memory_space<vmem>>, %arg3: memref<8x3xf32, #tpu.memory_space<vmem>>, %arg4: memref<8x1xf32, #tpu.memory_space<vmem>>, %arg5: memref<2x8x128xf32, #tpu.memory_space<vmem>>) attributes {dimension_semantics = [#tpu.dimension_semantics<parallel>, #tpu.dimension_semantics<parallel>], iteration_bounds = array<i64: 1, 2>, scalar_prefetch = 0 : i64, scratch_operands = 0 : i64, tpu.core_type = #tpu.core_type<tc>, window_params = [{transform_indices = @transform_0, window_bounds = array<i64: 2, 3, 128>}, {pipeline_mode = #tpu.pipeline_mode<synchronous>, transform_indices = @transform_1, window_bounds = array<i64: 8, 3>}, {pipeline_mode = #tpu.pipeline_mode<synchronous>, transform_indices = @transform_2, window_bounds = array<i64: 8, 1>}, {transform_indices = @transform_3, window_bounds = array<i64: 2, 8, 128>}]} {
    %c0 = arith.constant 0 : index
    %c0_0 = arith.constant 0 : index
    %0 = vector.load %arg3[%c0, %c0_0] : memref<8x3xf32, #tpu.memory_space<vmem>>, vector<8x3xf32>
    %c0_1 = arith.constant 0 : index
    %c0_2 = arith.constant 0 : index
    %1 = vector.load %arg4[%c0_1, %c0_2] : memref<8x1xf32, #tpu.memory_space<vmem>>, vector<8x1xf32>
    %c0_3 = arith.constant 0 : index
    %c0_4 = arith.constant 0 : index
    %c0_5 = arith.constant 0 : index
    %2 = vector.load %arg2[%c0_3, %c0_4, %c0_5] : memref<2x3x128xf32, #tpu.memory_space<vmem>>, vector<1x3x128xf32>
    %3 = vector.shape_cast %2 : vector<1x3x128xf32> to vector<3x128xf32>
    %4 = vector.extract_strided_slice %0 {offsets = [0, 0], sizes = [8, 1], strides = [1, 1]} : vector<8x3xf32> to vector<8x1xf32>
    %5 = vector.extract_strided_slice %3 {offsets = [0, 0], sizes = [1, 128], strides = [1, 1]} : vector<3x128xf32> to vector<1x128xf32>
    %6 = vector.broadcast %4 : vector<8x1xf32> to vector<8x128xf32>
    %7 = vector.broadcast %5 : vector<1x128xf32> to vector<8x128xf32>
    %8 = arith.mulf %6, %7 : vector<8x128xf32>
    %9 = vector.extract_strided_slice %0 {offsets = [0, 1], sizes = [8, 1], strides = [1, 1]} : vector<8x3xf32> to vector<8x1xf32>
    %10 = vector.extract_strided_slice %3 {offsets = [1, 0], sizes = [1, 128], strides = [1, 1]} : vector<3x128xf32> to vector<1x128xf32>
    %11 = vector.broadcast %9 : vector<8x1xf32> to vector<8x128xf32>
    %12 = vector.broadcast %10 : vector<1x128xf32> to vector<8x128xf32>
    %13 = arith.mulf %11, %12 : vector<8x128xf32>
    %14 = arith.addf %8, %13 : vector<8x128xf32>
    %15 = vector.extract_strided_slice %0 {offsets = [0, 2], sizes = [8, 1], strides = [1, 1]} : vector<8x3xf32> to vector<8x1xf32>
    %16 = vector.extract_strided_slice %3 {offsets = [2, 0], sizes = [1, 128], strides = [1, 1]} : vector<3x128xf32> to vector<1x128xf32>
    %17 = vector.broadcast %15 : vector<8x1xf32> to vector<8x128xf32>
    %18 = vector.broadcast %16 : vector<1x128xf32> to vector<8x128xf32>
    %19 = arith.mulf %17, %18 : vector<8x128xf32>
    %20 = arith.addf %14, %19 : vector<8x128xf32>
    %21 = vector.broadcast %1 : vector<8x1xf32> to vector<8x128xf32>
    %22 = arith.addf %20, %21 : vector<8x128xf32>
    %cst = arith.constant -5.000000e-01 : f32
    %23 = vector.broadcast %cst : f32 to vector<8x128xf32>
    %24 = arith.maximumf %22, %23 : vector<8x128xf32>
    %cst_6 = arith.constant 5.000000e-01 : f32
    %25 = vector.broadcast %cst_6 : f32 to vector<8x128xf32>
    %26 = arith.minimumf %24, %25 : vector<8x128xf32>
    %c0_7 = arith.constant 0 : index
    %c0_8 = arith.constant 0 : index
    %c0_9 = arith.constant 0 : index
    %27 = vector.load %arg5[%c0_7, %c0_8, %c0_9] : memref<2x8x128xf32, #tpu.memory_space<vmem>>, vector<1x8x128xf32>
    %28 = vector.shape_cast %27 : vector<1x8x128xf32> to vector<8x128xf32>
    %29 = vector.shape_cast %26 : vector<8x128xf32> to vector<1x8x128xf32>
    tpu.vector_store %arg5[%c0_7, %c0_8, %c0_9], %29 {strides = array<i32>} : memref<2x8x128xf32, #tpu.memory_space<vmem>>, vector<1x8x128xf32>,
    %c1 = arith.constant 1 : index
    %c0_10 = arith.constant 0 : index
    %c0_11 = arith.constant 0 : index
    %30 = vector.load %arg2[%c1, %c0_10, %c0_11] : memref<2x3x128xf32, #tpu.memory_space<vmem>>, vector<1x3x128xf32>
    %31 = vector.shape_cast %30 : vector<1x3x128xf32> to vector<3x128xf32>
    %32 = vector.extract_strided_slice %0 {offsets = [0, 0], sizes = [8, 1], strides = [1, 1]} : vector<8x3xf32> to vector<8x1xf32>
    %33 = vector.extract_strided_slice %31 {offsets = [0, 0], sizes = [1, 128], strides = [1, 1]} : vector<3x128xf32> to vector<1x128xf32>
    %34 = vector.broadcast %32 : vector<8x1xf32> to vector<8x128xf32>
    %35 = vector.broadcast %33 : vector<1x128xf32> to vector<8x128xf32>
    %36 = arith.mulf %34, %35 : vector<8x128xf32>
    %37 = vector.extract_strided_slice %0 {offsets = [0, 1], sizes = [8, 1], strides = [1, 1]} : vector<8x3xf32> to vector<8x1xf32>
    %38 = vector.extract_strided_slice %31 {offsets = [1, 0], sizes = [1, 128], strides = [1, 1]} : vector<3x128xf32> to vector<1x128xf32>
    %39 = vector.broadcast %37 : vector<8x1xf32> to vector<8x128xf32>
    %40 = vector.broadcast %38 : vector<1x128xf32> to vector<8x128xf32>
    %41 = arith.mulf %39, %40 : vector<8x128xf32>
    %42 = arith.addf %36, %41 : vector<8x128xf32>
    %43 = vector.extract_strided_slice %0 {offsets = [0, 2], sizes = [8, 1], strides = [1, 1]} : vector<8x3xf32> to vector<8x1xf32>
    %44 = vector.extract_strided_slice %31 {offsets = [2, 0], sizes = [1, 128], strides = [1, 1]} : vector<3x128xf32> to vector<1x128xf32>
    %45 = vector.broadcast %43 : vector<8x1xf32> to vector<8x128xf32>
    %46 = vector.broadcast %44 : vector<1x128xf32> to vector<8x128xf32>
    %47 = arith.mulf %45, %46 : vector<8x128xf32>
    %48 = arith.addf %42, %47 : vector<8x128xf32>
    %49 = vector.broadcast %1 : vector<8x1xf32> to vector<8x128xf32>
    %50 = arith.addf %48, %49 : vector<8x128xf32>
    %cst_12 = arith.constant -5.000000e-01 : f32
    %51 = vector.broadcast %cst_12 : f32 to vector<8x128xf32>
    %52 = arith.maximumf %50, %51 : vector<8x128xf32>
    %cst_13 = arith.constant 5.000000e-01 : f32
    %53 = vector.broadcast %cst_13 : f32 to vector<8x128xf32>
    %54 = arith.minimumf %52, %53 : vector<8x128xf32>
    %c1_14 = arith.constant 1 : index
    %c0_15 = arith.constant 0 : index
    %c0_16 = arith.constant 0 : index
    %55 = vector.load %arg5[%c1_14, %c0_15, %c0_16] : memref<2x8x128xf32, #tpu.memory_space<vmem>>, vector<1x8x128xf32>
    %56 = vector.shape_cast %55 : vector<1x8x128xf32> to vector<8x128xf32>
    %57 = vector.shape_cast %54 : vector<8x128xf32> to vector<1x8x128xf32>
    tpu.vector_store %arg5[%c1_14, %c0_15, %c0_16], %57 {strides = array<i32>} : memref<2x8x128xf32, #tpu.memory_space<vmem>>, vector<1x8x128xf32>,
    return
  }
  func.func @transform_0(%arg0: i32, %arg1: i32) -> (i32, i32, i32) {
    %c0_i32 = arith.constant 0 : i32
    %c0_i32_0 = arith.constant 0 : i32
    return %arg0, %c0_i32, %arg1 : i32, i32, i32
  }
  func.func @transform_1(%arg0: i32, %arg1: i32) -> (i32, i32) {
    %c0_i32 = arith.constant 0 : i32
    %c0_i32_0 = arith.constant 0 : i32
    %c0_i32_1 = arith.constant 0 : i32
    return %c0_i32, %c0_i32_0 : i32, i32
  }
  func.func @transform_2(%arg0: i32, %arg1: i32) -> (i32, i32) {
    %c0_i32 = arith.constant 0 : i32
    %c0_i32_0 = arith.constant 0 : i32
    %c0_i32_1 = arith.constant 0 : i32
    return %c0_i32, %c0_i32_0 : i32, i32
  }
  func.func @transform_3(%arg0: i32, %arg1: i32) -> (i32, i32, i32) {
    %c0_i32 = arith.constant 0 : i32
    %c0_i32_0 = arith.constant 0 : i32
    return %arg0, %c0_i32, %arg1 : i32, i32, i32
  }
}

</mosaic_0001>

<bundles_post_ra>
// kernel: tpu_custom_call.1
= control target key start
LH: loop header
LB: loop body
LE: loop exit
PB: predicated region body
PF: predicated region fallthrough
CT: control target
= control target key end

     0   :  { %8 = vsyncpa [#allocation4], 0  ;;  %s717_s0 = inlined_call_operand.vmem [shape: f32[2,3,256], index: 0, kind: input, shape index: {}]   ;;  %s718_s1 = inlined_call_operand.vmem [shape: f32[8,3], index: 1, kind: input, shape index: {}]   ;;  %s719_s2 = inlined_call_operand.vmem [shape: f32[8,1], index: 2, kind: input, shape index: {}]   ;;  %s720_s3 = inlined_call_operand.hbm [shape: f32[2,8,256], index: 3, kind: output, shape index: {}]  }
   0x1   :  { %10 = vsyncpa [#allocation4 + $0x1], 0  ;;  %s587_s12 = smov 0   ;;  %s589_s13 = smov 0  }
   0x2   :  { %s591_s14 = smov 0   ;;  %s593_s15 = smov 0  }
   0x3   :  { %s595_s16 = smov 0   ;;  %s597_s17 = smov 0  }
   0x4 LB: > { %s397_s18 = sadd.s32 4294967295, %s558_s17   ;;  %s398_s19 = sadd.s32 4294967294, %s558_s17   ;;  %s558_s17 = sphi %s597_s17, %s16_s17   ;;  %s554_s16 = sphi %s595_s16, %s727_s16   ;;  %s550_s15 = sphi %s593_s15, %s726_s15   ;;  %s546_s14 = sphi %s591_s14, %s725_s14   ;;  %s542_s13 = sphi %s589_s13, %s724_s13   ;;  %s538_s12 = sphi %s587_s12, %s723_s12  }
   0x5   : > { %s25_s20 = sadd.s32 1, %s554_s16  ;;  %s37_s21 = sadd.s32 1, %s546_s14 }
   0x6   : > { %p26_p0 = scmp.ge.s32.totalorder %s25_s20, 2  ;;  %p44_p1 = scmp.ne.s32.totalorder %s546_s14, %s542_s13 }
   0x7   : > { %p45_p2 = scmp.eq.s32.totalorder %s558_s17, 0  ;;  %p118_p3 = scmp.eq.s32.totalorder %s397_s18, 1 }
   0x8   : > { %s729_s20 = smov (%p26_p0, %s25_s20), 0  ;;  %p123_p6 = scmp.ne.s32.totalorder %s542_s13, %s538_s12 }
   0x9   : > { %p46_p4 = por %p45_p2, %p44_p1  ;;  %p626_p5 = por %p118_p3, %p44_p1 }
   0xa   : > { %s33_s23 = ssub.s32 %s554_s16, %s729_s20  ;;  %p124_p8 = scmp.eq.s32.totalorder %s398_s19, 1 }
   0xb   : > { %p35_p7 = scmp.eq.s32.totalorder %s33_s23, 0  ;;  %p400_p10 = scmp.ge.s32.totalorder %s558_s17, 2 }
   0xc   : > { %p637_p9 = por %p124_p8, %p123_p6 }
   0xd   : > { %s635_s24 = scalar_select %p35_p7, %s546_s14, %s37_s21  }
   0xe   : > { %146 = sbr.rel (%p400_p10) target bundleno = 28 (0x1c), region = 24 }
  0x15   : > { %149 = sbr.rel (!%p46_p4) target bundleno = 28 (0x1c), region = 28  ;;  %s151_s26 = sand.u32 (%p46_p4), 1, %s546_s14  }
  0x16   : > { %s402_s27 = sshll.u32 (%p46_p4), %s554_s16, 2  ;;  %s401_s28 = sshll.u32 (%p46_p4), %s151_s26, 3 }
  0x17   : > { %s158_s4 = scalar_lea.vmem (%p46_p4), %s717_s0, %s402_s27  ;;  %s153_s5 = scalar_lea.vmem (%p46_p4), [#allocation2], %s401_s28 }
  0x18   : > { %v174_v0 = vld [vmem:[%s158_s4] sm:$0xf] (%p46_p4)  ;;  %v176_v1 = vld [vmem:[%s158_s4 + $0x8] sm:$0xf] (%p46_p4) }
  0x19   : > { %175 = vst [vmem:[%s153_s5] sm:$0xf] (%p46_p4), %v174_v0  ;;  %177 = vst [vmem:[%s153_s5 + $0x4] sm:$0xf] (%p46_p4), %v176_v1 }
  0x1c PF: > { %p403_p11 = scmp.ge.s32.totalorder %s558_s17, 1  ;;  %p203_p12 = scmp.lt.s32.totalorder %s558_s17, 3 }
  0x1e   : > { %p204_p13 = pnand %p403_p11, %p203_p12 }
  0x1f   : > { %v235_v2 = vld [vmem:[%s718_s1] sm:$0xff] (!%p204_p13)  ;;  %v560_v3 = vmov (!%p204_p13), 0   ;;  %v561_v4 = vmov (!%p204_p13), 2   ;;  %v562_v6 = vmov (!%p204_p13), 1   ;;  %v243_v7 = vlaneseq (!%p204_p13)  ;;  %s658_s10 = sand.u32 (!%p204_p13), 1, %s542_s13   ;;  %s411_s26 = sshll.u32 (!%p204_p13), %s550_s15, 7 }
  0x20   : > { %207 = sbr.rel (%p204_p13) target bundleno = 192 (0xc0), region = 69  ;;  %475 = vset.pattern.permute.xlu0 (!%p204_p13), %v560_v3  ;;  %477 = vset.pattern.permute.xlu1 (!%p204_p13), %v561_v4  ;;  %v236_v5 = vld [vmem:[%s719_s2] sm:$0xff] (!%p204_p13)  ;;  %s404_s11 = sshll.u32 (!%p204_p13), %s658_s10, 3 }
  0x21   : > { %240 = vperm.xlu0 (!%p204_p13), %475, %v235_v2   ;;  %259 = vperm.xlu1 (!%p204_p13), %477, %v235_v2   ;;  %v244_v8 = vshrl.u32 (!%p204_p13), %v243_v7, 7  ;;  %s212_s18 = scalar_lea.vmem (!%p204_p13), [#allocation2], %s404_s11  ;;  %s405_s19 = sshll.u32 (!%p204_p13), %s658_s10, 4 }
  0x22   : > { %v237_v10 = vld [vmem:[%s212_s18] sm:$0x7] (!%p204_p13)  ;;  %v407_v11 = vld [vmem:[%s212_s18 + $0x4] sm:$0x7] (!%p204_p13)  ;;  %s232_s21 = scalar_lea.vmem (!%p204_p13), [#allocation3], %s405_s19  ;;  %s668_s29 = scalar_lea.hbm (!%p204_p13), %s720_s3, %s411_s26 }
  0x23   : > { %v245_v9 = vsub.s32 (!%p204_p13), 0, %v244_v8  ;;  %v254_v12 = vsub.s32 (!%p204_p13), 1, %v244_v8  ;;  %v264_v13 = vsub.s32 (!%p204_p13), 2, %v244_v8  ;;  %s317_s23 = sshll.u32 (!%p204_p13), %s232_s21, 4  ;;  %s302_s30 = scalar_lea.sflag (!%p204_p13), [#allocation4], %s658_s10  ;;  %s663_s23 = int_to_ptr.vmem [resolvable:$true] %s317_s23 }
  0x24   : > { %s480_s4 = scalar_lea.vmem (!%p204_p13), %s663_s23, 256  ;;  %s563_s15 = smov (!%p204_p13), [#allocation3]  }
  0x25   : > { %476 = vset.pattern.permute.xlu0 (!%p204_p13), %v562_v6  ;;  %478 = vset.pattern.permute.xlu1 (!%p204_p13), %v560_v3  ;;  %v246_v15 = vrot.slane (!%p204_p13), %v237_v10, %v245_v9  ;;  %v282_v16 = vrot.slane (!%p204_p13), %v407_v11, %v245_v9  ;;  %v255_v17 = vrot.slane (!%p204_p13), %v237_v10, %v254_v12  ;;  %p481_p0 = scmp.ne.s32.totalorder (!%p204_p13), %s663_s23, %s480_s4  ;;  %s484_s5 = sshll.u32 (!%p204_p13), %s563_s15, 4  ;;  %s485_s5 = int_to_ptr.vmem [resolvable:$false] %s484_s5 }
  0x26   : > { %249 = vperm.xlu0 (!%p204_p13), %476, %v235_v2   ;;  %270 = vperm.xlu1 (!%p204_p13), %478, %v236_v5   ;;  %v287_v18 = vrot.slane (!%p204_p13), %v407_v11, %v254_v12  ;;  %v265_v19 = vrot.slane (!%p204_p13), %v237_v10, %v264_v13  ;;  %v293_v20 = vrot.slane (!%p204_p13), %v407_v11, %v264_v13  ;;  %s486_s6 = scalar_lea.vmem (!%p204_p13), %s485_s5, 512  ;;  %p487_p3 = scmp.lt.s32.totalorder (!%p204_p13), %s663_s23, %s485_s5 }
  0x27   : > { %p482_p1 = pnand %p481_p0, %p626_p5  ;;  %p488_p4 = scmp.lt.s32.totalorder %s486_s6, %s480_s4 }
  0x29   : > { %p483_p2 = pneg %p482_p1  ;;  %p489_p6 = por %p488_p4, %p487_p3 }
  0x2a   : > { %479 = vset.pattern.permute.xlu0 %v560_v3 }
  0x2b   : > { %p490_p7 = pnand %p489_p6, %p483_p2 }
  0xa0   : > { %v241_v14 = vpop.permute.xlu0 %240  ;;  %v260_v21 = vpop.permute.xlu1 %259 }
  0xa1   : > { %v247_v22 = vmul.f32 %v246_v15, %v241_v14  ;;  %v283_v23 = vmul.f32 %v282_v16, %v241_v14  ;;  %v266_v27 = vmul.f32 %v265_v19, %v260_v21  ;;  %v294_v28 = vmul.f32 %v293_v20, %v260_v21 }
  0xa5   : > { %v250_v24 = vpop.permute.xlu0 %249  ;;  %v271_v31 = vpop.permute.xlu1 %270 }
  0xa6   : > { %v256_v25 = vmul.f32 %v255_v17, %v250_v24  ;;  %v288_v26 = vmul.f32 %v287_v18, %v250_v24 }
  0xa8   : > { %v257_v29 = vadd.f32 %v256_v25, %v247_v22  ;;  %v289_v30 = vadd.f32 %v288_v26, %v283_v23 }
  0xaa   : > { %v267_v32 = vadd.f32 %v266_v27, %v257_v29  ;;  %v295_v33 = vadd.f32 %v294_v28, %v289_v30 }
  0xac   : > { %v273_v34 = vadd.f32 %v271_v31, %v267_v32  ;;  %v296_v35 = vadd.f32 %v295_v33, %v271_v31 }
  0xae   : > { %v406_v36 = vclamps-f32 %v273_v34, 0.5  ;;  %v408_v37 = vclamps-f32 %v296_v35, 0.5 }
  0xb0   : > { %276 = vst [vmem:[%s232_s21] sm:$0xff] %v406_v36  ;;  %409 = vst [vmem:[%s232_s21 + $0x8] sm:$0xff] %v408_v37 }
  0xb1   : > { %493 = shalt.err (!%p490_p7)
}
  0xb2   : > { %s494_s7 = scalar_lea.hbm %s668_s29, 256  ;;  %s498_s11 = scalar_lea.hbm %s720_s3, 512 }
  0xb3   : > { %p495_p8 = scmp.ne.s32.totalorder %s668_s29, %s494_s7  ;;  %p499_p13 = scmp.lt.u32.totalorder %s668_s29, %s720_s3 }
  0xb4   : > { %p500_p0 = scmp.lt.u32.totalorder %s498_s11, %s494_s7  ;;  %p502_p2 = scmp.lt.u32.totalorder %s494_s7, %s668_s29 }
  0xb5   : > { %p496_p11 = pnand %p495_p8, %p626_p5 }
  0xb6   : > { %p501_p1 = por %p500_p0, %p499_p13 }
  0xb7   : > { %p497_p12 = pneg %p496_p11 }
  0xb8   : > { %p503_p3 = por %p502_p2, %p501_p1 }
  0xba   : > { %p504_p4 = pnand %p503_p3, %p497_p12 }
  0xbc   : > { %507 = shalt.err (!%p504_p4)
}
  0xbd   : > { %s564_s21 = smov 128   ;;  %s565_s26 = smov 256  }
  0xbe   : > { %s566_s27 = smov 8  }
  0xbf   : > { %414 = dma.vmem_to_hbm [thread:$0]  (%p626_p5), %s663_s23, 256, %s668_s29, %s302_s30, %s564_s21, %s565_s26, %s566_s27  }
  0xc0 PF: > { %s332_s28 = sand.u32 1, %s538_s12   ;;  %p417_p6 = pnand %p400_p10, %p637_p9 }
  0xc1   : > { %s333_s4 = scalar_lea.sflag [#allocation4], %s332_s28 }
  0xc2   : > { %533 = dma.done.wait (!%p417_p6), %s333_s4, 256  }
  0xc3   : > { %535 = vsyncadd (!%p417_p6), %s333_s4, 4294967040  ;;  %s16_s17 = sadd.s32 1, %s558_s17   ;;  %s723_s12 = smov %s542_s13 }
  0xc4   : > { %p13_p7 = scmp.ge.s32.totalorder %s16_s17, 4   ;;  %s724_s13 = smov %s546_s14 }
  0xc5   : > { %s725_s14 = smov %s635_s24  ;;  %s726_s15 = smov %s554_s16 }
  0xc6   : > { %s727_s16 = smov %s729_s20  ;;  %15 = sbr.rel (!%p13_p7) target bundleno = 4 (0x4), region = 115 }
  0xcd   :  { %338 = vsyncpa [#allocation4], 1 }
  0xce   :  { %340 = vsyncpa [#allocation4 + $0x1], 1 }

</bundles_post_ra>
